<compile_context>
chip_gen: v7x
topology: tpu7x:2x2x1
jax: 0.10.0
libtpu: 0.0.40
codegen_flags: <defaults>
</compile_context>

<pallas_src>
import math
from functools import lru_cache

import numpy as np
import jax
import jax.numpy as jnp
from jax import lax
from jax.experimental import pallas as pl
from jax.experimental.pallas import tpu as pltpu


# ----------------------------------------------------------------------------
# Host-side deterministic parameter construction (matches module __init__).
# ----------------------------------------------------------------------------
def gaussian_lloyd_levels(bits: int = 4, iters: int = 20) -> np.ndarray:
    """Lloyd-Max levels for N(0,1); closed-form Gaussian integrals replace
    scipy.integrate.quad used by the PyTorch reference."""
    n = 2 ** bits
    levels = np.linspace(-3.0, 3.0, n)
    sqrt2pi = math.sqrt(2.0 * math.pi)

    def phi(x):
        return 0.0 if np.isinf(x) else math.exp(-0.5 * x * x) / sqrt2pi

    def Phi(x):
        if x == -np.inf:
            return 0.0
        if x == np.inf:
            return 1.0
        return 0.5 * (1.0 + math.erf(x / math.sqrt(2.0)))

    for _ in range(iters):
        boundaries = np.zeros(n + 1)
        boundaries[1:-1] = (levels[1:] + levels[:-1]) / 2.0
        boundaries[0] = -np.inf
        boundaries[-1] = np.inf
        new_levels = []
        for i in range(n):
            a, b = boundaries[i], boundaries[i + 1]
            num = phi(a) - phi(b)          # integral of x*pdf(x) over [a, b]
            den = Phi(b) - Phi(a)          # integral of pdf(x) over [a, b]
            new_levels.append(num / den if den > 1e-10 else levels[i])
        levels = np.array(new_levels)
    return levels.astype(np.float32)


@lru_cache(maxsize=None)
def _hadamard_aux_np(lane_block: int) -> np.ndarray:
    """Normalized Sylvester Hadamard (2^(-7/2) * H128), optionally expanded to
    a 256x256 block-diagonal for the wide-MXU chips. Symmetric + orthonormal."""
    H = np.array([[1.0]], dtype=np.float64)
    while H.shape[0] < 128:
        H = np.block([[H, H], [H, -H]])
    H = H * (2.0 ** (-3.5))                       # H @ H.T == I
    if lane_block == 256:
        Z = np.zeros_like(H)
        H = np.block([[H, Z], [Z, H]])
    return H.astype(np.float32)


def hadamard_aux_matrix_bf16(lane_block: int = 128) -> jnp.ndarray:
    return jnp.asarray(_hadamard_aux_np(lane_block), jnp.bfloat16)


def _choose_lane_block(D: int) -> int:
    """256-wide block-diagonal aux on 256x256-MXU chips (v6e/v7x), 128 on the
    128x128-MXU generations (v5e and older)."""
    if D % 256 != 0:
        return 128
    try:
        kind = jax.devices()[0].device_kind.lower()
    except Exception:
        kind = ""
    if ("v2" in kind) or ("v3" in kind) or ("v4" in kind) or ("v5" in kind):
        return 128
    return 256


def _choose_tm(M: int, D: int, itemsize: int) -> int:
    """Row-tile size: ~4-6 MiB per tile buffer, multiple of 256 when possible,
    multiple of 8 always; small M gets a single small tile."""
    m8 = max(8, -(-M // 8) * 8)
    if M <= 256:
        return m8
    cap = max(8, int((6 << 20) // (D * itemsize)) // 8 * 8)
    if cap >= 256:
        cap = min(1024, cap // 256 * 256)
    return min(cap, m8)


# ----------------------------------------------------------------------------
# Pallas kernel.
# ----------------------------------------------------------------------------
def make_hgcq_kernel(levels: np.ndarray, nb: int, lb: int):
    lv = np.asarray(levels, np.float64)
    n = lv.shape[0]
    half = n // 2
    # Enforce exact odd symmetry (the Lloyd-Max fixed point for N(0,1) is
    # symmetric; this only removes <=1e-7 float noise vs the torch reference).
    lv = 0.5 * (lv - lv[::-1])
    pos = [float(v) for v in lv[half:]]                          # 8 levels > 0
    pmids = [float(0.5 * (pos[i] + pos[i + 1])) for i in range(half - 1)]
    inv_d = 1.0 / float(nb * lb)
    unrolled = nb <= 8

    def kernel(x_ref, h_ref, o_ref):
        h = h_ref[...]                               # (lb, lb) bf16, symmetric

        # --- per-row RMS straight from x (H orthonormal: ||xH||^2 == ||x||^2)
        def sq_block(start):
            xb = x_ref[:, pl.ds(start, lb)].astype(jnp.float32)
            return jnp.sum(xb * xb, axis=-1, keepdims=True)

        if unrolled:
            sq = sq_block(0)
            for b in range(1, nb):
                sq = sq + sq_block(b * lb)
        else:
            sq = lax.fori_loop(
                1, nb,
                lambda b, acc: acc + sq_block(pl.multiple_of(b * lb, lb)),
                sq_block(0))

        std = jnp.sqrt(sq * inv_d) + 1e-8            # (tm, 1) f32
        inv_std = pl.reciprocal(std, approx=True)    # EUP slot, ~free

        # --- fused per-block: transform -> quantize -> back-transform -> store
        def block_body(start):
            xb = x_ref[:, pl.ds(start, lb)]
            hb = jnp.dot(xb.astype(jnp.bfloat16), h,
                         preferred_element_type=jnp.float32)     # x_had block
            hn = hb * inv_std                                    # normalized
            a = jnp.abs(hn)
            # Symmetric Lloyd-Max levels: scan |hn| over the 7 positive
            # boundaries (scalar immediates), then restore the sign.  Strict
            # '>' keeps the lower level at exact positive midpoints and the
            # negative level at hn == 0, matching torch.argmin's first-index
            # tie rule (negative-side midpoint ties differ; measure zero).
            best = jnp.full_like(a, pos[0])
            for i in range(1, half):
                best = jnp.where(a > pmids[i - 1], pos[i], best)
            q = jnp.where(hn > 0.0, best, -best)
            # Back-transform (H symmetric => H.T == H); de-normalize on the
            # f32 MXU output (per-row scalar commutes with the matmul).
            ob = jnp.dot(q.astype(jnp.bfloat16), h,
                         preferred_element_type=jnp.float32) * std
            o_ref[:, pl.ds(start, lb)] = ob.astype(o_ref.dtype)

        if unrolled:
            for b in range(nb):
                block_body(b * lb)
        else:
            lax.fori_loop(
                0, nb,
                lambda b, c: (block_body(pl.multiple_of(b * lb, lb)), c)[1],
                0)

    return kernel


def hadamard_gaussian_clip_quantize(x, levels, *, lane_block=None, tm=None):
    """Forward of HadamardGaussianClipQuantizer. x: (..., D), D % 128 == 0.
    Output dtype follows x.dtype (pass bf16 in/out on HBM-bound v5e)."""
    orig_shape = x.shape
    D = orig_shape[-1]
    assert D % 128 == 0, "hidden dim must be a multiple of 128"
    if lane_block is None:
        lane_block = _choose_lane_block(D)
    assert D % lane_block == 0
    nb = D // lane_block
    aux = hadamard_aux_matrix_bf16(lane_block)

    x2 = x.reshape(-1, D)
    M = x2.shape[0]
    itemsize = jnp.dtype(x.dtype).itemsize
    if tm is None:
        tm = _choose_tm(M, D, itemsize)

    tile_bytes = tm * D * itemsize
    # in + out tiles, double-buffered, + aux + headroom; the fused kernel has
    # no large intermediates, so this stays well under v7x's 64 MiB VMEM.
    vmem_limit = int(min(max(4 * tile_bytes + (4 << 20), 32 << 20), 56 << 20))

    kernel = make_hgcq_kernel(levels, nb, lane_block)
    out = pl.pallas_call(
        kernel,
        out_shape=jax.ShapeDtypeStruct((M, D), x.dtype),
        grid_spec=pltpu.PrefetchScalarGridSpec(
            num_scalar_prefetch=0,
            grid=(pl.cdiv(M, tm),),       # ragged last tile handled by Pallas
            in_specs=[
                pl.BlockSpec((tm, D), lambda i: (i, 0)),                 # rows
                pl.BlockSpec((lane_block, lane_block), lambda i: (0, 0)),  # H
            ],
            out_specs=pl.BlockSpec((tm, D), lambda i: (i, 0)),
        ),
        compiler_params=pltpu.CompilerParams(
            dimension_semantics=("parallel",),
            vmem_limit_bytes=vmem_limit),
    )(x2, aux)

    return out.reshape(orig_shape)


# ----------------------------------------------------------------------------
# Demo.
# ----------------------------------------------------------------------------
if __name__ == "__main__":
    bits = 4
    levels = gaussian_lloyd_levels(bits)

    B, S, D = 2, 8, 256                     # hidden must be a multiple of 128
    key = jax.random.PRNGKey(0)
    x = jax.random.normal(key, (B, S, D), dtype=jnp.float32)

    out = hadamard_gaussian_clip_quantize(x, levels)
    jax.block_until_ready(out)

    assert out.shape == (B, S, D) and out.dtype == x.dtype
    assert bool(jnp.all(jnp.isfinite(out)))
    # 4-bit Lloyd-Max in the (orthonormal) Hadamard domain preserves energy to
    # within ~1%: loose sanity check of the forward value.
    e_in = float(jnp.mean(x * x))
    e_out = float(jnp.mean(out * out))
    assert abs(e_out / e_in - 1.0) < 0.1
    print("KERNEL_OK")
</pallas_src>

<mosaic_0001>
module attributes {stable_mosaic.version = 11 : i64} {
  func.func @kernel(%arg0: i32, %arg1: memref<16x256xf32, #tpu.memory_space<vmem>>, %arg2: memref<256x256xbf16, #tpu.memory_space<vmem>>, %arg3: memref<16x256xf32, #tpu.memory_space<vmem>>) attributes {dimension_semantics = [#tpu.dimension_semantics<parallel>], iteration_bounds = array<i64: 1>, scalar_prefetch = 0 : i64, scratch_operands = 0 : i64, tpu.core_type = #tpu.core_type<tc>, window_params = [{transform_indices = @transform_0, window_bounds = array<i64: 16, 256>}, {pipeline_mode = #tpu.pipeline_mode<synchronous>, transform_indices = @transform_1, window_bounds = array<i64: 256, 256>}, {transform_indices = @transform_2, window_bounds = array<i64: 16, 256>}]} {
    %c0 = arith.constant 0 : index
    %c0_0 = arith.constant 0 : index
    %0 = vector.load %arg2[%c0, %c0_0] : memref<256x256xbf16, #tpu.memory_space<vmem>>, vector<256x256xbf16>
    %c0_1 = arith.constant 0 : index
    %c0_2 = arith.constant 0 : index
    %1 = vector.load %arg1[%c0_1, %c0_2] : memref<16x256xf32, #tpu.memory_space<vmem>>, vector<16x256xf32>
    %2 = arith.mulf %1, %1 : vector<16x256xf32>
    %cst = arith.constant dense<0.000000e+00> : vector<16xf32>
    %3 = vector.multi_reduction <add>, %2, %cst [1] : vector<16x256xf32> to vector<16xf32>
    %4 = vector.shape_cast %3 : vector<16xf32> to vector<16x1xf32>
    %cst_3 = arith.constant 3.906250e-03 : f32
    %5 = vector.broadcast %cst_3 : f32 to vector<16x1xf32>
    %6 = arith.mulf %4, %5 : vector<16x1xf32>
    %7 = math.sqrt %6 : vector<16x1xf32>
    %cst_4 = arith.constant 9.99999993E-9 : f32
    %8 = vector.broadcast %cst_4 : f32 to vector<16x1xf32>
    %9 = arith.addf %7, %8 : vector<16x1xf32>
    %10 = tpu.reciprocal %9 {approx = true} : vector<16x1xf32> -> vector<16x1xf32>
    %c0_5 = arith.constant 0 : index
    %c0_6 = arith.constant 0 : index
    %11 = vector.load %arg1[%c0_5, %c0_6] : memref<16x256xf32, #tpu.memory_space<vmem>>, vector<16x256xf32>
    %12 = arith.truncf %11 : vector<16x256xf32> to vector<16x256xbf16>
    %cst_7 = arith.constant dense<0.000000e+00> : vector<16x256xf32>
    %13 = tpu.matmul %12, %0, %cst_7 {dimension_numbers = #tpu.dot_dimension_numbers<[1], [0], [0], [1], [0, 0, 1, 1], [], []>} : vector<16x256xbf16>, vector<256x256xbf16>, vector<16x256xf32> -> vector<16x256xf32>
    %14 = vector.broadcast %10 : vector<16x1xf32> to vector<16x256xf32>
    %15 = arith.mulf %13, %14 : vector<16x256xf32>
    %16 = math.absf %15 : vector<16x256xf32>
    %cst_8 = arith.constant 0.162266552 : f32
    %17 = vector.broadcast %cst_8 : f32 to vector<16x256xf32>
    %cst_9 = arith.constant 0.324961722 : f32
    %18 = vector.broadcast %cst_9 : f32 to vector<16x256xf32>
    %19 = arith.cmpf ogt, %16, %18 : vector<16x256xf32>
    %cst_10 = arith.constant 0.487656862 : f32
    %20 = vector.broadcast %cst_10 : f32 to vector<16x256xf32>
    %21 = arith.select %19, %20, %17 : vector<16x256xi1>, vector<16x256xf32>
    %cst_11 = arith.constant 0.651883364 : f32
    %22 = vector.broadcast %cst_11 : f32 to vector<16x256xf32>
    %23 = arith.cmpf ogt, %16, %22 : vector<16x256xf32>
    %cst_12 = arith.constant 0.816109836 : f32
    %24 = vector.broadcast %cst_12 : f32 to vector<16x256xf32>
    %25 = arith.select %23, %24, %21 : vector<16x256xi1>, vector<16x256xf32>
    %cst_13 = arith.constant 0.983825087 : f32
    %26 = vector.broadcast %cst_13 : f32 to vector<16x256xf32>
    %27 = arith.cmpf ogt, %16, %26 : vector<16x256xf32>
    %cst_14 = arith.constant 1.1515404 : f32
    %28 = vector.broadcast %cst_14 : f32 to vector<16x256xf32>
    %29 = arith.select %27, %28, %25 : vector<16x256xi1>, vector<16x256xf32>
    %cst_15 = arith.constant 1.32661653 : f32
    %30 = vector.broadcast %cst_15 : f32 to vector<16x256xf32>
    %31 = arith.cmpf ogt, %16, %30 : vector<16x256xf32>
    %cst_16 = arith.constant 1.50169277 : f32
    %32 = vector.broadcast %cst_16 : f32 to vector<16x256xf32>
    %33 = arith.select %31, %32, %29 : vector<16x256xi1>, vector<16x256xf32>
    %cst_17 = arith.constant 1.69224644 : f32
    %34 = vector.broadcast %cst_17 : f32 to vector<16x256xf32>
    %35 = arith.cmpf ogt, %16, %34 : vector<16x256xf32>
    %cst_18 = arith.constant 1.882800e+00 : f32
    %36 = vector.broadcast %cst_18 : f32 to vector<16x256xf32>
    %37 = arith.select %35, %36, %33 : vector<16x256xi1>, vector<16x256xf32>
    %cst_19 = arith.constant 2.1078198 : f32
    %38 = vector.broadcast %cst_19 : f32 to vector<16x256xf32>
    %39 = arith.cmpf ogt, %16, %38 : vector<16x256xf32>
    %cst_20 = arith.constant 2.33283949 : f32
    %40 = vector.broadcast %cst_20 : f32 to vector<16x256xf32>
    %41 = arith.select %39, %40, %37 : vector<16x256xi1>, vector<16x256xf32>
    %cst_21 = arith.constant 2.65141606 : f32
    %42 = vector.broadcast %cst_21 : f32 to vector<16x256xf32>
    %43 = arith.cmpf ogt, %16, %42 : vector<16x256xf32>
    %cst_22 = arith.constant 2.96999264 : f32
    %44 = vector.broadcast %cst_22 : f32 to vector<16x256xf32>
    %45 = arith.select %43, %44, %41 : vector<16x256xi1>, vector<16x256xf32>
    %cst_23 = arith.constant 0.000000e+00 : f32
    %46 = vector.broadcast %cst_23 : f32 to vector<16x256xf32>
    %47 = arith.cmpf ogt, %15, %46 : vector<16x256xf32>
    %cst_24 = arith.constant 0.000000e+00 : f32
    %48 = vector.broadcast %cst_24 : f32 to vector<16x256xf32>
    %49 = arith.subf %48, %45 : vector<16x256xf32>
    %50 = arith.select %47, %45, %49 : vector<16x256xi1>, vector<16x256xf32>
    %51 = arith.truncf %50 : vector<16x256xf32> to vector<16x256xbf16>
    %cst_25 = arith.constant dense<0.000000e+00> : vector<16x256xf32>
    %52 = tpu.matmul %51, %0, %cst_25 {dimension_numbers = #tpu.dot_dimension_numbers<[1], [0], [0], [1], [0, 0, 1, 1], [], []>} : vector<16x256xbf16>, vector<256x256xbf16>, vector<16x256xf32> -> vector<16x256xf32>
    %53 = vector.broadcast %9 : vector<16x1xf32> to vector<16x256xf32>
    %54 = arith.mulf %52, %53 : vector<16x256xf32>
    %c0_26 = arith.constant 0 : index
    %c0_27 = arith.constant 0 : index
    %55 = vector.load %arg3[%c0_26, %c0_27] : memref<16x256xf32, #tpu.memory_space<vmem>>, vector<16x256xf32>
    tpu.vector_store %arg3[%c0_26, %c0_27], %54 {strides = array<i32>} : memref<16x256xf32, #tpu.memory_space<vmem>>, vector<16x256xf32>,
    return
  }
  func.func @transform_0(%arg0: i32) -> (i32, i32) {
    %c0_i32 = arith.constant 0 : i32
    %c0_i32_0 = arith.constant 0 : i32
    return %arg0, %c0_i32 : i32, i32
  }
  func.func @transform_1(%arg0: i32) -> (i32, i32) {
    %c0_i32 = arith.constant 0 : i32
    %c0_i32_0 = arith.constant 0 : i32
    %c0_i32_1 = arith.constant 0 : i32
    return %c0_i32, %c0_i32_0 : i32, i32
  }
  func.func @transform_2(%arg0: i32) -> (i32, i32) {
    %c0_i32 = arith.constant 0 : i32
    %c0_i32_0 = arith.constant 0 : i32
    return %arg0, %c0_i32 : i32, i32
  }
}

</mosaic_0001>

<bundles_post_ra>
// kernel: tpu_custom_call.1
= control target key start
LH: loop header
LB: loop body
LE: loop exit
PB: predicated region body
PF: predicated region fallthrough
CT: control target
= control target key end

     0   :  { %7 = vsyncpa [#allocation3], 0  ;;  %s731_s0 = inlined_call_operand.hbm [shape: f32[16,256], index: 0, kind: input, shape index: {}]   ;;  %s732_s1 = inlined_call_operand.hbm [shape: bf16[256,256], index: 1, kind: input, shape index: {}]   ;;  %s733_s2 = inlined_call_operand.hbm [shape: f32[16,256], index: 2, kind: output, shape index: {}]  }
   0x1   :  { %8 = vsyncpa [#allocation6], 0 }
   0x2   :  { %9 = vsyncpa [#allocation4], 0  ;;  %s626_s9 = smov [#allocation2]   ;;  %s554_s13 = scalar_lea.hbm %s731_s0, 512 }
   0x3   :  { %s15_s10 = sshll.u32 %s626_s9, 4  ;;  %p555_p0 = scmp.ne.s32.totalorder %s731_s0, %s554_s13  ;;  %s16_s10 = int_to_ptr.vmem [resolvable:$true] %s15_s10 }
   0x4   :  { %p558_p1 = scmp.lt.u32.totalorder %s554_s13, %s731_s0 }
   0x6   :  { %p560_p2 = pnand %p558_p1, %p555_p0 }
   0x8   :  { %563 = shalt.err (!%p560_p2)
}
   0x9   :  { %s564_s18 = scalar_lea.vmem %s16_s10, 512  ;;  %p569_p4 = scmp.lt.s32.totalorder %s16_s10, %s16_s10 }
   0xa   :  { %p565_p3 = scmp.ne.s32.totalorder %s16_s10, %s564_s18  ;;  %p570_p5 = scmp.lt.s32.totalorder %s564_s18, %s564_s18 }
   0xc   :  { %p571_p6 = por %p570_p5, %p569_p4 }
   0xe   :  { %p572_p7 = pnand %p571_p6, %p565_p3 }
  0x10   :  { %575 = shalt.err (!%p572_p7)
}
  0x11   :  { %s627_s19 = smov 256   ;;  %s628_s20 = smov 16  }
  0x12   :  { %21 = dma.hbm_to_vmem [thread:$0]  %s731_s0, 512, %s16_s10, [#allocation3], %s627_s19, %s627_s19, %s628_s20  }
  0x13   :  { %s629_s23 = smov [#allocation5]   ;;  %s576_s27 = scalar_lea.hbm %s732_s1, 4096 }
  0x14   :  { %s27_s24 = sshll.u32 %s629_s23, 4  ;;  %p577_p8 = scmp.ne.s32.totalorder %s732_s1, %s576_s27  ;;  %s28_s24 = int_to_ptr.vmem [resolvable:$true] %s27_s24 }
  0x15   :  { %p580_p9 = scmp.lt.u32.totalorder %s576_s27, %s732_s1 }
  0x17   :  { %p582_p10 = pnand %p580_p9, %p577_p8 }
  0x19   :  { %585 = shalt.err (!%p582_p10)
}
  0x1a   :  { %s586_s4 = scalar_lea.vmem %s28_s24, 4096  ;;  %p591_p12 = scmp.lt.s32.totalorder %s28_s24, %s28_s24 }
  0x1b   :  { %p587_p11 = scmp.ne.s32.totalorder %s28_s24, %s586_s4  ;;  %p592_p13 = scmp.lt.s32.totalorder %s586_s4, %s586_s4 }
  0x1d   :  { %p593_p0 = por %p592_p13, %p591_p12 }
  0x1f   :  { %p594_p1 = pnand %p593_p0, %p587_p11 }
  0x21   :  { %597 = shalt.err (!%p594_p1)
}
  0x22   :  { %s630_s0 = smov 128   ;;  %s631_s5 = smov 8  }
  0x23   :  { %33 = dma.hbm_to_vmem [thread:$0]  %s732_s1, 4096, %s28_s24, [#allocation6], %s630_s0, %s630_s0, %s631_s5  }
  0x24   :  { %620 = dma.done.wait [#allocation3], 512  }
  0x25   :  { %621 = vsyncadd [#allocation3], 4294966784 }
  0x26   :  { %622 = dma.done.wait [#allocation6], 4096  }
  0x27   :  { %623 = vsyncadd [#allocation6], 4294963200  ;;  %v498_v0 = vld [vmem:[#allocation5 + $0x4] ss:$8 sps:$4 sm:$0xff]   ;;  %v500_v1 = vld [vmem:[#allocation5] ss:$8 sps:$4 sm:$0xff]  }
  0x28   :  { %268 = vmatprep.subr.bf16.mxu0 %v498_v0  ;;  %v501_v2 = vld [vmem:[#allocation5 + $0x14] ss:$8 sps:$4 sm:$0xff]   ;;  %389 = vmatprep.subr.bf16.mxu1 %v498_v0  ;;  %v503_v3 = vld [vmem:[#allocation5 + $0x10] ss:$8 sps:$4 sm:$0xff]   ;;  %v504_v4 = vld [vmem:[#allocation5 + $0x24] ss:$8 sps:$4 sm:$0xff]  }
  0x29   :  { %269 = vmatpush1.bf16.msra.mxu0 %v500_v1  ;;  %390 = vmatpush1.bf16.msra.mxu1 %v500_v1  ;;  %v506_v5 = vld [vmem:[#allocation5 + $0x20] ss:$8 sps:$4 sm:$0xff]   ;;  %v507_v6 = vld [vmem:[#allocation5 + $0x34] ss:$8 sps:$4 sm:$0xff]   ;;  %v509_v7 = vld [vmem:[#allocation5 + $0x30] ss:$8 sps:$4 sm:$0xff]  }
  0x2a   :  { %270 = vmatprep.subr.bf16.mxu0 %v501_v2  ;;  %391 = vmatprep.subr.bf16.mxu1 %v501_v2  ;;  %v510_v8 = vld [vmem:[#allocation5 + $0x44] ss:$8 sps:$4 sm:$0xff]   ;;  %v512_v9 = vld [vmem:[#allocation5 + $0x40] ss:$8 sps:$4 sm:$0xff]   ;;  %v513_v10 = vld [vmem:[#allocation5 + $0x54] ss:$8 sps:$4 sm:$0xff]  }
  0x2b   :  { %v515_v11 = vld [vmem:[#allocation5 + $0x50] ss:$8 sps:$4 sm:$0xff]   ;;  %v516_v12 = vld [vmem:[#allocation5 + $0x64] ss:$8 sps:$4 sm:$0xff]   ;;  %v518_v19 = vld [vmem:[#allocation5 + $0x60] ss:$8 sps:$4 sm:$0xff]  }
  0x2c   :  { %v73_v13 = vld [vmem:[#allocation2 + $0x8] sm:$0xff]  ;;  %v75_v14 = vld [vmem:[#allocation2 + $0x18] sm:$0xff]  ;;  %v676_v16 = vld [vmem:[#allocation2] sm:$0xff]  ;;  %s633_s1 = smov [#allocation7]  }
  0x2d   :  { %271 = vmatpush1.bf16.msra.mxu0 %v503_v3  ;;  %392 = vmatpush1.bf16.msra.mxu1 %v503_v3  ;;  %v107_v15 = vpack.c.bf16 %v75_v14, %v73_v13  ;;  %v678_v17 = vld [vmem:[#allocation2 + $0x10] sm:$0xff]  ;;  %v77_v18 = vmul.f32 %v73_v13, %v73_v13  ;;  %v79_v20 = vmul.f32 %v75_v14, %v75_v14  ;;  %v522_v27 = vld [vmem:[#allocation5 + $0x84] ss:$8 sps:$4 sm:$0xff]   ;;  %v524_v28 = vld [vmem:[#allocation5 + $0x80] ss:$8 sps:$4 sm:$0xff]   ;;  %s445_s8 = sshll.u32 %s633_s1, 4  ;;  %s446_s8 = int_to_ptr.vmem [resolvable:$true] %s445_s8 }
  0x2e   :  { %272 = vmatprep.subr.bf16.mxu0 %v504_v4  ;;  %393 = vmatprep.subr.bf16.mxu1 %v504_v4  ;;  %v76_v21 = vmul.f32 %v676_v16, %v676_v16  ;;  %v78_v22 = vmul.f32 %v678_v17, %v678_v17  ;;  %v519_v23 = vld [vmem:[#allocation5 + $0x74] ss:$8 sps:$4 sm:$0xff]   ;;  %v521_v25 = vld [vmem:[#allocation5 + $0x70] ss:$8 sps:$4 sm:$0xff]   ;;  %v528_v31 = vld [vmem:[#allocation5 + $0xa4] ss:$8 sps:$4 sm:$0xff]   ;;  %v106_v43 = vpack.c.bf16 %v678_v17, %v676_v16  ;;  %p603_p3 = scmp.lt.s32.totalorder %s446_s8, %s446_s8 }
  0x2f   :  { %300 = vmatprep.mubr.bf16.mxu0 %v107_v15  ;;  %v525_v29 = vld [vmem:[#allocation5 + $0x94] ss:$8 sps:$4 sm:$0xff]   ;;  %v527_v30 = vld [vmem:[#allocation5 + $0x90] ss:$8 sps:$4 sm:$0xff]   ;;  %v530_v32 = vld [vmem:[#allocation5 + $0xa0] ss:$8 sps:$4 sm:$0xff]  }
  0x30   :  { %v80_v24 = vadd.f32 %v77_v18, %v76_v21  ;;  %v83_v26 = vadd.f32 %v79_v20, %v78_v22  ;;  %v531_v33 = vld [vmem:[#allocation5 + $0xb4] ss:$8 sps:$4 sm:$0xff]   ;;  %v533_v34 = vld [vmem:[#allocation5 + $0xb0] ss:$8 sps:$4 sm:$0xff]   ;;  %v534_v35 = vld [vmem:[#allocation5 + $0xc4] ss:$8 sps:$4 sm:$0xff]  }
  0x31   :  { %273 = vmatpush1.bf16.msra.mxu0 %v506_v5  ;;  %394 = vmatpush1.bf16.msra.mxu1 %v506_v5  ;;  %v536_v36 = vld [vmem:[#allocation5 + $0xc0] ss:$8 sps:$4 sm:$0xff]   ;;  %v537_v37 = vld [vmem:[#allocation5 + $0xd4] ss:$8 sps:$4 sm:$0xff]   ;;  %v539_v38 = vld [vmem:[#allocation5 + $0xd0] ss:$8 sps:$4 sm:$0xff]  }
  0x32   :  { %274 = vmatprep.subr.bf16.mxu0 %v507_v6  ;;  %395 = vmatprep.subr.bf16.mxu1 %v507_v6  ;;  %v540_v39 = vld [vmem:[#allocation5 + $0xe4] ss:$8 sps:$4 sm:$0xff]   ;;  %v542_v40 = vld [vmem:[#allocation5 + $0xe0] ss:$8 sps:$4 sm:$0xff]   ;;  %v543_v41 = vld [vmem:[#allocation5 + $0xf4] ss:$8 sps:$4 sm:$0xff]  }
  0x33   :  { %81 = vadd.xlane.f32.xlu0 %v80_v24  ;;  %v545_v42 = vld [vmem:[#allocation5 + $0xf0] ss:$8 sps:$4 sm:$0xff]   ;;  %s598_s9 = scalar_lea.vmem %s446_s8, 512 }
  0x34   :  { %p599_p2 = scmp.ne.s32.totalorder %s446_s8, %s598_s9  ;;  %p604_p4 = scmp.lt.s32.totalorder %s598_s9, %s598_s9 }
  0x35   :  { %275 = vmatpush1.bf16.msra.mxu0 %v509_v7  ;;  %396 = vmatpush1.bf16.msra.mxu1 %v509_v7 }
  0x36   :  { %276 = vmatprep.subr.bf16.mxu0 %v510_v8  ;;  %397 = vmatprep.subr.bf16.mxu1 %v510_v8  ;;  %v632_v8 = vmov 0.16226655   ;;  %p605_p5 = por %p604_p4, %p603_p3 }
  0x37   :  { %84 = vadd.xlane.f32.xlu0 %v83_v26 }
  0x38   :  { %p606_p6 = pnand %p605_p5, %p599_p2 }
  0x39   :  { %277 = vmatpush1.bf16.msra.mxu0 %v512_v9  ;;  %398 = vmatpush1.bf16.msra.mxu1 %v512_v9 }
  0x3a   :  { %278 = vmatprep.subr.bf16.mxu0 %v513_v10  ;;  %399 = vmatprep.subr.bf16.mxu1 %v513_v10 }
  0x3d   :  { %279 = vmatpush1.bf16.msra.mxu0 %v515_v11  ;;  %400 = vmatpush1.bf16.msra.mxu1 %v515_v11 }
  0x3e   :  { %280 = vmatprep.subr.bf16.mxu0 %v516_v12  ;;  %401 = vmatprep.subr.bf16.mxu1 %v516_v12 }
  0x41   :  { %281 = vmatpush1.bf16.msra.mxu0 %v518_v19  ;;  %402 = vmatpush1.bf16.msra.mxu1 %v518_v19 }
  0x42   :  { %282 = vmatprep.subr.bf16.mxu0 %v519_v23  ;;  %403 = vmatprep.subr.bf16.mxu1 %v519_v23 }
  0x45   :  { %283 = vmatpush1.bf16.msra.mxu0 %v521_v25  ;;  %404 = vmatpush1.bf16.msra.mxu1 %v521_v25 }
  0x46   :  { %284 = vmatprep.subr.bf16.mxu0 %v522_v27  ;;  %405 = vmatprep.subr.bf16.mxu1 %v522_v27 }
  0x49   :  { %285 = vmatpush1.bf16.msra.mxu0 %v524_v28  ;;  %406 = vmatpush1.bf16.msra.mxu1 %v524_v28 }
  0x4a   :  { %286 = vmatprep.subr.bf16.mxu0 %v525_v29  ;;  %407 = vmatprep.subr.bf16.mxu1 %v525_v29 }
  0x4d   :  { %287 = vmatpush1.bf16.msra.mxu0 %v527_v30  ;;  %408 = vmatpush1.bf16.msra.mxu1 %v527_v30 }
  0x4e   :  { %288 = vmatprep.subr.bf16.mxu0 %v528_v31  ;;  %409 = vmatprep.subr.bf16.mxu1 %v528_v31 }
  0x51   :  { %289 = vmatpush1.bf16.msra.mxu0 %v530_v32  ;;  %410 = vmatpush1.bf16.msra.mxu1 %v530_v32 }
  0x52   :  { %290 = vmatprep.subr.bf16.mxu0 %v531_v33  ;;  %411 = vmatprep.subr.bf16.mxu1 %v531_v33 }
  0x55   :  { %291 = vmatpush1.bf16.msra.mxu0 %v533_v34  ;;  %412 = vmatpush1.bf16.msra.mxu1 %v533_v34 }
  0x56   :  { %292 = vmatprep.subr.bf16.mxu0 %v534_v35  ;;  %413 = vmatprep.subr.bf16.mxu1 %v534_v35 }
  0x59   :  { %293 = vmatpush1.bf16.msra.mxu0 %v536_v36  ;;  %414 = vmatpush1.bf16.msra.mxu1 %v536_v36 }
  0x5a   :  { %294 = vmatprep.subr.bf16.mxu0 %v537_v37  ;;  %415 = vmatprep.subr.bf16.mxu1 %v537_v37 }
  0x5d   :  { %295 = vmatpush1.bf16.msra.mxu0 %v539_v38  ;;  %416 = vmatpush1.bf16.msra.mxu1 %v539_v38 }
  0x5e   :  { %296 = vmatprep.subr.bf16.mxu0 %v540_v39  ;;  %417 = vmatprep.subr.bf16.mxu1 %v540_v39 }
  0x61   :  { %297 = vmatpush1.bf16.msra.mxu0 %v542_v40  ;;  %418 = vmatpush1.bf16.msra.mxu1 %v542_v40 }
  0x62   :  { %298 = vmatprep.subr.bf16.mxu0 %v543_v41  ;;  %419 = vmatprep.subr.bf16.mxu1 %v543_v41 }
  0x65   :  { %299 = vmatpush1.bf16.msra.mxu0 %v545_v42  ;;  %420 = vmatpush1.bf16.msra.mxu1 %v545_v42 }
  0x68   :  { %301 = vmatmul.mubr.bf16.vlgmr.msra.gmra.mrb[0].mxu0 %v106_v43 }
  0xc0   :  { %v82_v44 = vpop.xlane.xlu0 %81 }
  0xc1   :  { %v86_v45 = vmul.f32 0.00390625, %v82_v44 }
  0xc3   :  { %546 = vrsqrt.f32 %v86_v45  ;;  %vm90_vm0 = vcmp.eq.f32.partialorder %v86_v45, inf  ;;  %v93_v51 = vand.u32 2147483648, %v86_v45  ;;  %vm92_vm2 = vcmp.eq.f32.partialorder %v86_v45, 0.0 }
  0xc4   :  { %v85_v46 = vpop.xlane.xlu0 %84 }
  0xc5   :  { %v87_v47 = vmul.f32 0.00390625, %v85_v46 }
  0xc7   :  { %548 = vrsqrt.f32 %v87_v47  ;;  %vm97_vm1 = vcmp.eq.f32.partialorder %v87_v47, inf  ;;  %v100_v54 = vand.u32 2147483648, %v87_v47  ;;  %vm99_vm3 = vcmp.eq.f32.partialorder %v87_v47, 0.0 }
  0xcd   :  { %v547_v48 = vpop.eup %546 }
  0xce   :  { %v89_v50 = vmul.f32 %v547_v48, %v86_v45 }
  0xd0   :  { %v91_v53 = vsel %vm90_vm0, %v86_v45, %v89_v50 }
  0xd1   :  { %v549_v49 = vpop.eup %548  ;;  %v94_v56 = vsel %vm92_vm2, %v93_v51, %v91_v53 }
  0xd2   :  { %v96_v52 = vmul.f32 %v549_v49, %v87_v47  ;;  %v686_v57 = vadd.f32 1e-08, %v94_v56 }
  0xd4   :  { %v98_v55 = vsel %vm97_vm1, %v87_v47, %v96_v52  ;;  %550 = vrcp.f32 %v686_v57 }
  0xd5   :  { %v101_v58 = vsel %vm99_vm3, %v100_v54, %v98_v55 }
  0xd6   :  { %v688_v59 = vadd.f32 1e-08, %v101_v58 }
  0xd8   :  { %552 = vrcp.f32 %v688_v59 }
  0xde   :  { %v551_v60 = vpop.eup %550 }
  0xe2   :  { %v553_v2 = vpop.eup %552 }
 0x13b   :  { %v302_v61 = vpop.f32.mrb[0].mxu0 }
 0x13c   :  { %v311_v62 = vmul.f32 %v551_v60, %v302_v61  ;;  %v304_v63 = vpop.f32.mrb[1].mxu0 }
 0x13d   :  { %v692_v0 = vmul.f32 %v551_v60, %v304_v63  ;;  %v306_v1 = vpop.f32.mrb[2].mxu0 }
 0x13e   :  { %v315_v3 = vand.u32 2147483647, %v311_v62  ;;  %v308_v4 = vpop.f32.mrb[3].mxu0  ;;  %v313_v5 = vmul.f32 %v553_v2, %v306_v1  ;;  %vm375_vm0 = vcmp.gt.f32.partialorder %v311_v62, 0.0 }
 0x13f   :  { %v695_v6 = vand.u32 2147483647, %v692_v0  ;;  %v697_v7 = vmul.f32 %v553_v2, %v308_v4 }
 0x140   :  { %vm319_vm4 = vcmp.gt.f32.partialorder %v315_v3, 0.32496172  ;;  %vm327_vm5 = vcmp.gt.f32.partialorder %v315_v3, 0.65188336  ;;  %vm335_vm6 = vcmp.gt.f32.partialorder %v315_v3, 0.9838251 }
 0x141   :  { %v323_v9 = vsel %vm319_vm4, 0.48765686, %v632_v8  ;;  %vm343_vm7 = vcmp.gt.f32.partialorder %v315_v3, 1.3266165  ;;  %vm351_vm8 = vcmp.gt.f32.partialorder %v315_v3, 1.6922464 }
 0x142   :  { %v331_v10 = vsel %vm327_vm5, 0.81610984, %v323_v9  ;;  %vm359_vm9 = vcmp.gt.f32.partialorder %v315_v3, 2.1078198  ;;  %vm367_vm10 = vcmp.gt.f32.partialorder %v315_v3, 2.651416 }
 0x143   :  { %v339_v11 = vsel %vm335_vm6, 1.1515404, %v331_v10  ;;  %v317_v12 = vand.u32 2147483647, %v313_v5  ;;  %v318_v14 = vand.u32 2147483647, %v697_v7 }
 0x144   :  { %v347_v13 = vsel %vm343_vm7, 1.5016928, %v339_v11  ;;  %vm320_vm11 = vcmp.gt.f32.partialorder %v695_v6, 0.32496172  ;;  %vm328_vm5 = vcmp.gt.f32.partialorder %v695_v6, 0.65188336 }
 0x145   :  { %v355_v15 = vsel %vm351_vm8, 1.8828, %v347_v13  ;;  %vm321_vm12 = vcmp.gt.f32.partialorder %v317_v12, 0.32496172  ;;  %vm329_vm13 = vcmp.gt.f32.partialorder %v317_v12, 0.65188336 }
 0x146   :  { %v363_v16 = vsel %vm359_vm9, 2.3328395, %v355_v15  ;;  %v325_v17 = vsel %vm321_vm12, 0.48765686, %v632_v8  ;;  %vm337_vm14 = vcmp.gt.f32.partialorder %v317_v12, 0.9838251 }
 0x147   :  { %v371_v18 = vsel %vm367_vm10, 2.9699926, %v363_v16  ;;  %v333_v19 = vsel %vm329_vm13, 0.81610984, %v325_v17  ;;  %vm345_vm15 = vcmp.gt.f32.partialorder %v317_v12, 1.3266165 }
 0x148   :  { %v379_v20 = vsub.f32 0.0, %v371_v18  ;;  %v341_v21 = vsel %vm337_vm14, 1.1515404, %v333_v19  ;;  %vm353_vm1 = vcmp.gt.f32.partialorder %v317_v12, 1.6922464  ;;  %vm377_vm7 = vcmp.gt.f32.partialorder %v313_v5, 0.0 }
 0x149   :  { %v349_v22 = vsel %vm345_vm15, 1.5016928, %v341_v21  ;;  %vm361_vm2 = vcmp.gt.f32.partialorder %v317_v12, 2.1078198  ;;  %vm369_vm3 = vcmp.gt.f32.partialorder %v317_v12, 2.651416 }
 0x14a   :  { %v357_v23 = vsel %vm353_vm1, 1.8828, %v349_v22  ;;  %vm322_vm4 = vcmp.gt.f32.partialorder %v318_v14, 0.32496172  ;;  %v324_v24 = vsel %vm320_vm11, 0.48765686, %v632_v8  ;;  %v383_v31 = vsel %vm375_vm0, %v371_v18, %v379_v20 }
 0x14b   :  { %v365_v25 = vsel %vm361_vm2, 2.3328395, %v357_v23  ;;  %v326_v26 = vsel %vm322_vm4, 0.48765686, %v632_v8  ;;  %vm330_vm6 = vcmp.gt.f32.partialorder %v318_v14, 0.65188336 }
 0x14c   :  { %v373_v27 = vsel %vm369_vm3, 2.9699926, %v365_v25  ;;  %v332_v28 = vsel %vm328_vm5, 0.81610984, %v324_v24  ;;  %v334_v30 = vsel %vm330_vm6, 0.81610984, %v326_v26 }
 0x14d   :  { %v381_v29 = vsub.f32 0.0, %v373_v27  ;;  %vm336_vm8 = vcmp.gt.f32.partialorder %v695_v6, 0.9838251  ;;  %vm338_vm9 = vcmp.gt.f32.partialorder %v318_v14, 0.9838251  ;;  %vm376_vm2 = vcmp.gt.f32.partialorder %v692_v0, 0.0 }
 0x14e   :  { %v340_v32 = vsel %vm336_vm8, 1.1515404, %v332_v28  ;;  %vm344_vm10 = vcmp.gt.f32.partialorder %v695_v6, 1.3266165  ;;  %v342_v34 = vsel %vm338_vm9, 1.1515404, %v334_v30 }
 0x14f   :  { %v385_v33 = vsel %vm377_vm7, %v373_v27, %v381_v29  ;;  %vm346_vm11 = vcmp.gt.f32.partialorder %v318_v14, 1.3266165  ;;  %v348_v35 = vsel %vm344_vm10, 1.5016928, %v340_v32  ;;  %vm352_vm12 = vcmp.gt.f32.partialorder %v695_v6, 1.6922464 }
 0x150   :  { %v350_v36 = vsel %vm346_vm11, 1.5016928, %v342_v34  ;;  %vm354_vm13 = vcmp.gt.f32.partialorder %v318_v14, 1.6922464  ;;  %v387_v37 = vpack.c.bf16 %v385_v33, %v383_v31  ;;  %v356_v38 = vsel %vm352_vm12, 1.8828, %v348_v35 }
 0x151   :  { %v358_v39 = vsel %vm354_vm13, 1.8828, %v350_v36  ;;  %vm360_vm14 = vcmp.gt.f32.partialorder %v695_v6, 2.1078198  ;;  %vm362_vm15 = vcmp.gt.f32.partialorder %v318_v14, 2.1078198 }
 0x152   :  { %v364_v40 = vsel %vm360_vm14, 2.3328395, %v356_v38  ;;  %vm368_vm0 = vcmp.gt.f32.partialorder %v695_v6, 2.651416  ;;  %v366_v41 = vsel %vm362_vm15, 2.3328395, %v358_v39 }
 0x153   :  { %vm370_vm1 = vcmp.gt.f32.partialorder %v318_v14, 2.651416  ;;  %v372_v42 = vsel %vm368_vm0, 2.9699926, %v364_v40  ;;  %vm378_vm3 = vcmp.gt.f32.partialorder %v697_v7, 0.0 }
 0x154   :  { %v374_v43 = vsel %vm370_vm1, 2.9699926, %v366_v41  ;;  %v380_v44 = vsub.f32 0.0, %v372_v42 }
 0x155   :  { %v382_v45 = vsub.f32 0.0, %v374_v43 }
 0x156   :  { %v384_v46 = vsel %vm376_vm2, %v372_v42, %v380_v44 }
 0x157   :  { %v386_v47 = vsel %vm378_vm3, %v374_v43, %v382_v45 }
 0x158   :  { %v388_v48 = vpack.c.bf16 %v386_v47, %v384_v46 }
 0x15a   :  { %421 = vmatprep.mubr.bf16.mxu1 %v388_v48 }
 0x15b   :  { %422 = vmatmul.mubr.bf16.vlgmr.msra.gmra.mrb[0].mxu1 %v387_v37 }
 0x22e   :  { %v423_v49 = vpop.f32.mrb[0].mxu1 }
 0x22f   :  { %v432_v50 = vmul.f32 %v423_v49, %v686_v57  ;;  %v425_v51 = vpop.f32.mrb[1].mxu1 }
 0x230   :  { %v433_v52 = vmul.f32 %v425_v51, %v686_v57  ;;  %v427_v53 = vpop.f32.mrb[2].mxu1 }
 0x231   :  { %436 = vst [vmem:[#allocation7] sm:$0xff] %v432_v50  ;;  %v434_v54 = vmul.f32 %v427_v53, %v688_v59  ;;  %v429_v55 = vpop.f32.mrb[3].mxu1 }
 0x232   :  { %437 = vst [vmem:[#allocation7 + $0x8] sm:$0xff] %v433_v52  ;;  %v435_v56 = vmul.f32 %v429_v55, %v688_v59 }
 0x233   :  { %438 = vst [vmem:[#allocation7 + $0x10] sm:$0xff] %v434_v54 }
 0x234   :  { %439 = vst [vmem:[#allocation7 + $0x18] sm:$0xff] %v435_v56 }
 0x235   :  { %609 = shalt.err (!%p606_p6)
}
 0x236   :  { %s610_s12 = scalar_lea.hbm %s733_s2, 512 }
 0x237   :  { %p611_p7 = scmp.ne.s32.totalorder %s733_s2, %s610_s12  ;;  %p614_p8 = scmp.lt.u32.totalorder %s610_s12, %s733_s2 }
 0x239   :  { %p616_p9 = pnand %p614_p8, %p611_p7 }
 0x23b   :  { %619 = shalt.err (!%p616_p9)
}
 0x23c   :  { %451 = dma.vmem_to_hbm [thread:$0]  %s446_s8, 512, %s733_s2, [#allocation4], %s627_s19, %s627_s19, %s628_s20  }
 0x23d   :  { %624 = dma.done.wait [#allocation4], 512  }
 0x23e   :  { %625 = vsyncadd [#allocation4], 4294966784 }
 0x23f   :  { %455 = vsyncpa [#allocation3], 1 }
 0x240   :  { %456 = vsyncpa [#allocation6], 1 }
 0x241   :  { %457 = vsyncpa [#allocation4], 1 }

</bundles_post_ra>
